<compile_context>
chip_gen: v5e
topology: v5e:2x2
jax: 0.10.0
libtpu: 0.0.40
codegen_flags: <defaults>
</compile_context>

<pallas_src>
import functools

import jax
import jax.numpy as jnp
from jax.experimental import pallas as pl
from jax.experimental.pallas import tpu as pltpu

_LANE = 128


def _round_up(x, m):
    return (x + m - 1) // m * m


# ----------------------------------------------------------------------------
# Kernel
# ----------------------------------------------------------------------------
def _outhead_kernel(x_ref, w1_ref, b1_ref, w2_ref, b2_ref, w3_ref, b3_ref,
                    o_ref, h1_ref):
    cdt = w1_ref.dtype  # matmul-input (compute) dtype

    # fc_layer[0]: Linear(in_dim, hid0) + ReLU.
    # MXU inputs in compute dtype, f32 accumulation, f32 epilogue.
    h1 = jnp.dot(x_ref[...], w1_ref[...], preferred_element_type=jnp.float32)
    h1_ref[...] = jnp.maximum(h1 + b1_ref[...], 0.0).astype(h1_ref.dtype)

    # fc_layer[1]: Linear(hid0, hid1) + ReLU.
    # h2 is only (tm, 128): keep it in vregs, no VMEM staging round trip.
    h2 = jnp.dot(h1_ref[...], w2_ref[...], preferred_element_type=jnp.float32)
    h2 = jnp.maximum(h2 + b2_ref[...], 0.0).astype(cdt)

    # output_head: Linear(hid1, out_pad)  (lane-padded to 128, no activation).
    o = jnp.dot(h2, w3_ref[...], preferred_element_type=jnp.float32)
    o_ref[...] = (o + b3_ref[...]).astype(o_ref.dtype)


# ----------------------------------------------------------------------------
# Pallas call wrapper (jitted; x pad/cast happens inside the jit so each call
# is a single dispatch: pad+convert+pallas custom call)
# ----------------------------------------------------------------------------
@functools.partial(jax.jit, static_argnames=("Mp", "tm", "out_dtype"))
def _outhead_matrix_padded(x2d, w1, b1, w2, b2, w3p, b3p, *, Mp, tm, out_dtype):
    """x2d: [M, in_dim] -> lane-padded output slab [Mp, out_pad]."""
    M, in_dim = x2d.shape
    hid0 = w1.shape[1]
    hid1 = w2.shape[1]
    out_pad = w3p.shape[1]
    cdt = w1.dtype

    xp = x2d.astype(cdt)
    if Mp != M:
        xp = jnp.pad(xp, ((0, Mp - M), (0, 0)))

    grid = (Mp // tm,)

    flops = 2 * Mp * (in_dim * hid0 + hid0 * hid1 + hid1 * out_pad)
    bytes_accessed = (
        xp.size * xp.dtype.itemsize
        + sum(a.size * a.dtype.itemsize for a in (w1, b1, w2, b2, w3p, b3p))
        + Mp * out_pad * jnp.dtype(out_dtype).itemsize)

    return pl.pallas_call(
        _outhead_kernel,
        out_shape=jax.ShapeDtypeStruct((Mp, out_pad), out_dtype),
        grid_spec=pltpu.PrefetchScalarGridSpec(
            num_scalar_prefetch=0,
            grid=grid,
            in_specs=[
                pl.BlockSpec((tm, in_dim), lambda i: (i, 0)),     # x rows
                pl.BlockSpec((in_dim, hid0), lambda i: (0, 0)),   # W1 (resident)
                pl.BlockSpec((1, hid0), lambda i: (0, 0)),        # b1 (f32)
                pl.BlockSpec((hid0, hid1), lambda i: (0, 0)),     # W2 (resident)
                pl.BlockSpec((1, hid1), lambda i: (0, 0)),        # b2 (f32)
                pl.BlockSpec((hid1, out_pad), lambda i: (0, 0)),  # W3 (lane-padded)
                pl.BlockSpec((1, out_pad), lambda i: (0, 0)),     # b3 (lane-padded)
            ],
            out_specs=pl.BlockSpec((tm, out_pad), lambda i: (i, 0)),
            scratch_shapes=[
                pltpu.VMEM((tm, hid0), cdt),  # h1 staging only
            ],
        ),
        compiler_params=pltpu.CompilerParams(
            dimension_semantics=("parallel",),
            vmem_limit_bytes=32 * 1024 * 1024,
        ),
        cost_estimate=pl.CostEstimate(
            flops=flops, transcendentals=0, bytes_accessed=bytes_accessed),
    )(xp, w1, b1, w2, b2, w3p, b3p)


# ----------------------------------------------------------------------------
# Tiling / bucketing
# ----------------------------------------------------------------------------
def _choose_tiles(M, row_align, tm_max):
    """Pick (padded row count Mp, row tile tm).

    Small/medium M: bucket Mp to a power of two (stable set of compiled
    variants) and keep >= 2 grid steps so both v7x TensorCores get work.
    Large M: Mp is a multiple of the (power-of-two) row tile.
    """
    # Snap tm_max down to a power of two so it always divides Mp.
    tm_max = max(row_align, 1 << (max(int(tm_max), row_align).bit_length() - 1))
    if M <= 2 * tm_max:
        Mp = max(2 * row_align, pl.next_power_of_2(_round_up(M, row_align)))
        tm = min(tm_max, Mp // 2)
    else:
        tm = tm_max
        Mp = _round_up(M, tm)
    return Mp, tm


# ----------------------------------------------------------------------------
# Parameter preparation (hoisted out of the per-call path)
# ----------------------------------------------------------------------------
def init_outhead_params(key, in_dim, hid_dims=(512, 128), out_dim=11):
    """Deterministic synthetic parameters; shapes match nn.Linear layers
    (stored transposed, i.e. [fan_in, fan_out], so the kernel does x @ W)."""
    dims = [in_dim] + list(hid_dims) + [out_dim]
    params = []
    for fan_in, fan_out in zip(dims[:-1], dims[1:]):
        key, kw, kb = jax.random.split(key, 3)
        bound = 1.0 / (fan_in ** 0.5)
        w = jax.random.uniform(kw, (fan_in, fan_out), jnp.float32, -bound, bound)
        b = jax.random.uniform(kb, (fan_out,), jnp.float32, -bound, bound)
        params.append((w, b))
    return params


def prepare_outhead_params(params, compute_dtype=jnp.bfloat16):
    """Pad / cast the OutHead weights ONCE (at init time).

    Weights are cast to `compute_dtype` (bf16 default: native on v5e/v6e/v7x
    MXUs, halves weight DMA); biases stay f32; W3/b3 are zero-padded on the
    output axis to a full 128-lane slab so the kernel's output store is
    unmasked lane-dense.
    """
    (w1, b1), (w2, b2), (w3, b3) = params
    cdt = jnp.dtype(compute_dtype)
    out_dim = w3.shape[1]
    out_pad = _round_up(out_dim, _LANE)
    return dict(
        w1=jnp.asarray(w1, cdt),
        b1=jnp.asarray(b1, jnp.float32).reshape(1, -1),
        w2=jnp.asarray(w2, cdt),
        b2=jnp.asarray(b2, jnp.float32).reshape(1, -1),
        w3p=jnp.pad(jnp.asarray(w3, cdt), ((0, 0), (0, out_pad - out_dim))),
        b3p=jnp.pad(jnp.asarray(b3, jnp.float32).reshape(1, -1),
                    ((0, 0), (0, out_pad - out_dim))),
        out_dim=out_dim,
        out_pad=out_pad,
    )


# ----------------------------------------------------------------------------
# Public wrappers
# ----------------------------------------------------------------------------
def _outhead_padded_slab(x2d, prep, *, tm_max=512, out_dtype=jnp.float32):
    """[M, in_dim] -> lane-padded slab [Mp, out_pad] (rows >= M are padding)."""
    M = x2d.shape[0]
    cdt = prep["w1"].dtype
    row_align = 16 if cdt == jnp.dtype(jnp.bfloat16) else 8
    Mp, tm = _choose_tiles(M, row_align, tm_max)
    return _outhead_matrix_padded(
        x2d, prep["w1"], prep["b1"], prep["w2"], prep["b2"],
        prep["w3p"], prep["b3p"], Mp=Mp, tm=tm, out_dtype=out_dtype)


def outhead_matrix(x2d, prep, *, tm_max=512, out_dtype=jnp.float32):
    """[M, in_dim] -> [M, out_dim] through the 3-layer MLP."""
    slab = _outhead_padded_slab(x2d, prep, tm_max=tm_max, out_dtype=out_dtype)
    return slab[:x2d.shape[0], :prep["out_dim"]]


def outhead_forward(batch, prepared, return_dict=False, *,
                    tm_max=512, out_dtype=jnp.float32):
    """Mirrors OutHead.forward: batch['decoded_feat'] is [T, B, in_dim]."""
    feat = batch["decoded_feat"]                 # [T, B, D]
    T, B, D = feat.shape
    x2d = feat.reshape(T * B, D)                 # unsqueeze(-2) folded into rows

    slab = _outhead_padded_slab(x2d, prepared, tm_max=tm_max, out_dtype=out_dtype)
    out_dim = prepared["out_dim"]
    out_pad = prepared["out_pad"]

    # Consume the padded slab directly: drop padded rows, keep the padded lane
    # axis, and slice every field straight off it (no [M, out_dim] copy).
    slab = slab[:T * B].reshape(T, B, 1, out_pad)
    batch["d_xy"] = slab[..., :2]
    batch["z"] = slab[..., 2:3]
    batch["local_orient"] = slab[..., 3:9]
    batch["d_heading_vec"] = slab[..., 9:out_dim]
    out = slab[..., :out_dim]                    # [T, B, 1, out_dim]
    if return_dict:
        return batch
    return out


# ----------------------------------------------------------------------------
# Reference + self-test
# ----------------------------------------------------------------------------
def _reference_forward(feat, params):
    x = feat[:, :, None, :]
    for i, (w, b) in enumerate(params):
        x = x @ w + b
        if i < len(params) - 1:
            x = jnp.maximum(x, 0.0)
    return x


if __name__ == "__main__":
    key = jax.random.PRNGKey(0)
    k_feat, k_params, k_big = jax.random.split(key, 3)

    # Small shapes consistent with the module: decoded_feat [T, B, in_dim]
    T, B, in_dim = 8, 2, 32
    hid_dims = (512, 128)
    out_dim = 11

    decoded_feat = jax.random.normal(k_feat, (T, B, in_dim), jnp.float32)
    params = init_outhead_params(k_params, in_dim, hid_dims, out_dim)
    ref = _reference_forward(decoded_feat, params)

    # --- f32 compute path (strict tolerance) -----------------------------
    prep_f32 = prepare_outhead_params(params, compute_dtype=jnp.float32)
    batch = {"decoded_feat": decoded_feat}
    out = outhead_forward(batch, prep_f32, return_dict=False)
    out = jax.block_until_ready(out)

    assert out.shape == (T, B, 1, out_dim)
    assert batch["d_xy"].shape == (T, B, 1, 2)
    assert batch["z"].shape == (T, B, 1, 1)
    assert batch["local_orient"].shape == (T, B, 1, 6)
    assert batch["d_heading_vec"].shape == (T, B, 1, 2)
    assert jnp.allclose(out, ref, atol=1e-4, rtol=1e-4), "f32 mismatch vs reference"

    # --- default bf16-MXU path (looser tolerance) -------------------------
    prep_bf16 = prepare_outhead_params(params)   # compute_dtype=bf16 default
    batch_bf = {"decoded_feat": decoded_feat}
    out_bf = jax.block_until_ready(outhead_forward(batch_bf, prep_bf16))
    assert out_bf.dtype == jnp.float32
    assert jnp.allclose(out_bf, ref, atol=5e-2, rtol=5e-2), "bf16 mismatch vs reference"

    # bf16 output variant (halves writeback when the caller can take bf16)
    out_bf16out = jax.block_until_ready(
        outhead_forward({"decoded_feat": decoded_feat}, prep_bf16,
                        out_dtype=jnp.bfloat16))
    assert out_bf16out.dtype == jnp.bfloat16
    assert jnp.allclose(out_bf16out.astype(jnp.float32), ref,
                        atol=7e-2, rtol=7e-2), "bf16-out mismatch vs reference"

    # --- padded / multi-step-grid path (M not a tile multiple) ------------
    M_big = 320  # buckets to 512 rows -> grid of 2 steps of tm=256
    x_big = jax.random.normal(k_big, (M_big, in_dim), jnp.float32)
    out_big = jax.block_until_ready(outhead_matrix(x_big, prep_f32))
    ref_big = _reference_forward(x_big[None], params)[0, :, 0, :]
    assert out_big.shape == (M_big, out_dim)
    assert jnp.allclose(out_big, ref_big, atol=1e-4, rtol=1e-4), "padded-M mismatch"

    print("KERNEL_OK")
</pallas_src>

<mosaic_0001>
module attributes {stable_mosaic.version = 11 : i64} {
  func.func @_outhead_kernel(%arg0: i32, %arg1: memref<8x32xf32, #tpu.memory_space<vmem>>, %arg2: memref<32x512xf32, #tpu.memory_space<vmem>>, %arg3: memref<1x512xf32, #tpu.memory_space<vmem>>, %arg4: memref<512x128xf32, #tpu.memory_space<vmem>>, %arg5: memref<1x128xf32, #tpu.memory_space<vmem>>, %arg6: memref<128x128xf32, #tpu.memory_space<vmem>>, %arg7: memref<1x128xf32, #tpu.memory_space<vmem>>, %arg8: memref<8x128xf32, #tpu.memory_space<vmem>>, %arg9: memref<8x512xf32, #tpu.memory_space<vmem>>) attributes {dimension_semantics = [#tpu.dimension_semantics<parallel>], iteration_bounds = array<i64: 2>, scalar_prefetch = 0 : i64, scratch_operands = 1 : i64, tpu.core_type = #tpu.core_type<tc>, window_params = [{transform_indices = @transform_0, window_bounds = array<i64: 8, 32>}, {pipeline_mode = #tpu.pipeline_mode<synchronous>, transform_indices = @transform_1, window_bounds = array<i64: 32, 512>}, {pipeline_mode = #tpu.pipeline_mode<synchronous>, transform_indices = @transform_2, window_bounds = array<i64: 1, 512>}, {pipeline_mode = #tpu.pipeline_mode<synchronous>, transform_indices = @transform_3, window_bounds = array<i64: 512, 128>}, {pipeline_mode = #tpu.pipeline_mode<synchronous>, transform_indices = @transform_4, window_bounds = array<i64: 1, 128>}, {pipeline_mode = #tpu.pipeline_mode<synchronous>, transform_indices = @transform_5, window_bounds = array<i64: 128, 128>}, {pipeline_mode = #tpu.pipeline_mode<synchronous>, transform_indices = @transform_6, window_bounds = array<i64: 1, 128>}, {transform_indices = @transform_7, window_bounds = array<i64: 8, 128>}]} {
    %c0 = arith.constant 0 : index
    %c0_0 = arith.constant 0 : index
    %0 = vector.load %arg1[%c0, %c0_0] : memref<8x32xf32, #tpu.memory_space<vmem>>, vector<8x32xf32>
    %c0_1 = arith.constant 0 : index
    %c0_2 = arith.constant 0 : index
    %1 = vector.load %arg2[%c0_1, %c0_2] : memref<32x512xf32, #tpu.memory_space<vmem>>, vector<32x512xf32>
    %cst = arith.constant dense<0.000000e+00> : vector<8x512xf32>
    %2 = tpu.matmul %0, %1, %cst {dimension_numbers = #tpu.dot_dimension_numbers<[1], [0], [0], [1], [0, 0, 1, 1], [], []>} : vector<8x32xf32>, vector<32x512xf32>, vector<8x512xf32> -> vector<8x512xf32>
    %c0_3 = arith.constant 0 : index
    %c0_4 = arith.constant 0 : index
    %3 = vector.load %arg3[%c0_3, %c0_4] : memref<1x512xf32, #tpu.memory_space<vmem>>, vector<1x512xf32>
    %4 = vector.broadcast %3 : vector<1x512xf32> to vector<8x512xf32>
    %5 = arith.addf %2, %4 : vector<8x512xf32>
    %cst_5 = arith.constant 0.000000e+00 : f32
    %6 = vector.broadcast %cst_5 : f32 to vector<8x512xf32>
    %7 = arith.maximumf %5, %6 : vector<8x512xf32>
    %c0_6 = arith.constant 0 : index
    %c0_7 = arith.constant 0 : index
    %8 = vector.load %arg9[%c0_6, %c0_7] : memref<8x512xf32, #tpu.memory_space<vmem>>, vector<8x512xf32>
    tpu.vector_store %arg9[%c0_6, %c0_7], %7 {strides = array<i32>} : memref<8x512xf32, #tpu.memory_space<vmem>>, vector<8x512xf32>,
    %c0_8 = arith.constant 0 : index
    %c0_9 = arith.constant 0 : index
    %9 = vector.load %arg9[%c0_8, %c0_9] : memref<8x512xf32, #tpu.memory_space<vmem>>, vector<8x512xf32>
    %c0_10 = arith.constant 0 : index
    %c0_11 = arith.constant 0 : index
    %10 = vector.load %arg4[%c0_10, %c0_11] : memref<512x128xf32, #tpu.memory_space<vmem>>, vector<512x128xf32>
    %cst_12 = arith.constant dense<0.000000e+00> : vector<8x128xf32>
    %11 = tpu.matmul %9, %10, %cst_12 {dimension_numbers = #tpu.dot_dimension_numbers<[1], [0], [0], [1], [0, 0, 1, 1], [], []>} : vector<8x512xf32>, vector<512x128xf32>, vector<8x128xf32> -> vector<8x128xf32>
    %c0_13 = arith.constant 0 : index
    %c0_14 = arith.constant 0 : index
    %12 = vector.load %arg5[%c0_13, %c0_14] : memref<1x128xf32, #tpu.memory_space<vmem>>, vector<1x128xf32>
    %13 = vector.broadcast %12 : vector<1x128xf32> to vector<8x128xf32>
    %14 = arith.addf %11, %13 : vector<8x128xf32>
    %cst_15 = arith.constant 0.000000e+00 : f32
    %15 = vector.broadcast %cst_15 : f32 to vector<8x128xf32>
    %16 = arith.maximumf %14, %15 : vector<8x128xf32>
    %c0_16 = arith.constant 0 : index
    %c0_17 = arith.constant 0 : index
    %17 = vector.load %arg6[%c0_16, %c0_17] : memref<128x128xf32, #tpu.memory_space<vmem>>, vector<128x128xf32>
    %cst_18 = arith.constant dense<0.000000e+00> : vector<8x128xf32>
    %18 = tpu.matmul %16, %17, %cst_18 {dimension_numbers = #tpu.dot_dimension_numbers<[1], [0], [0], [1], [0, 0, 1, 1], [], []>} : vector<8x128xf32>, vector<128x128xf32>, vector<8x128xf32> -> vector<8x128xf32>
    %c0_19 = arith.constant 0 : index
    %c0_20 = arith.constant 0 : index
    %19 = vector.load %arg7[%c0_19, %c0_20] : memref<1x128xf32, #tpu.memory_space<vmem>>, vector<1x128xf32>
    %20 = vector.broadcast %19 : vector<1x128xf32> to vector<8x128xf32>
    %21 = arith.addf %18, %20 : vector<8x128xf32>
    %c0_21 = arith.constant 0 : index
    %c0_22 = arith.constant 0 : index
    %22 = vector.load %arg8[%c0_21, %c0_22] : memref<8x128xf32, #tpu.memory_space<vmem>>, vector<8x128xf32>
    tpu.vector_store %arg8[%c0_21, %c0_22], %21 {strides = array<i32>} : memref<8x128xf32, #tpu.memory_space<vmem>>, vector<8x128xf32>,
    return
  }
  func.func @transform_0(%arg0: i32) -> (i32, i32) {
    %c0_i32 = arith.constant 0 : i32
    %c0_i32_0 = arith.constant 0 : i32
    return %arg0, %c0_i32 : i32, i32
  }
  func.func @transform_1(%arg0: i32) -> (i32, i32) {
    %c0_i32 = arith.constant 0 : i32
    %c0_i32_0 = arith.constant 0 : i32
    %c0_i32_1 = arith.constant 0 : i32
    return %c0_i32, %c0_i32_0 : i32, i32
  }
  func.func @transform_2(%arg0: i32) -> (i32, i32) {
    %c0_i32 = arith.constant 0 : i32
    %c0_i32_0 = arith.constant 0 : i32
    %c0_i32_1 = arith.constant 0 : i32
    return %c0_i32, %c0_i32_0 : i32, i32
  }
  func.func @transform_3(%arg0: i32) -> (i32, i32) {
    %c0_i32 = arith.constant 0 : i32
    %c0_i32_0 = arith.constant 0 : i32
    %c0_i32_1 = arith.constant 0 : i32
    return %c0_i32, %c0_i32_0 : i32, i32
  }
  func.func @transform_4(%arg0: i32) -> (i32, i32) {
    %c0_i32 = arith.constant 0 : i32
    %c0_i32_0 = arith.constant 0 : i32
    %c0_i32_1 = arith.constant 0 : i32
    return %c0_i32, %c0_i32_0 : i32, i32
  }
  func.func @transform_5(%arg0: i32) -> (i32, i32) {
    %c0_i32 = arith.constant 0 : i32
    %c0_i32_0 = arith.constant 0 : i32
    %c0_i32_1 = arith.constant 0 : i32
    return %c0_i32, %c0_i32_0 : i32, i32
  }
  func.func @transform_6(%arg0: i32) -> (i32, i32) {
    %c0_i32 = arith.constant 0 : i32
    %c0_i32_0 = arith.constant 0 : i32
    %c0_i32_1 = arith.constant 0 : i32
    return %c0_i32, %c0_i32_0 : i32, i32
  }
  func.func @transform_7(%arg0: i32) -> (i32, i32) {
    %c0_i32 = arith.constant 0 : i32
    %c0_i32_0 = arith.constant 0 : i32
    return %arg0, %c0_i32 : i32, i32
  }
}

</mosaic_0001>

<bundles_post_ra>
// kernel: _outhead_matrix_padded.1
= control target key start
LH: loop header
LB: loop body
LE: loop exit
PB: predicated region body
PF: predicated region fallthrough
CT: control target
= control target key end

     0   :  { %s1369_s0 = inlined_call_operand.hbm [shape: f32[16,32], index: 0, kind: input, shape index: {}]   ;;  %s1370_s1 = inlined_call_operand.hbm [shape: f32[32,512], index: 1, kind: input, shape index: {}]   ;;  %s1371_s2 = inlined_call_operand.hbm [shape: f32[1,512], index: 2, kind: input, shape index: {}]   ;;  %s1372_s3 = inlined_call_operand.hbm [shape: f32[512,128], index: 3, kind: input, shape index: {}]   ;;  %s1373_s4 = inlined_call_operand.vmem [shape: f32[1,128], index: 4, kind: input, shape index: {}]   ;;  %s1374_s5 = inlined_call_operand.hbm [shape: f32[128,128], index: 5, kind: input, shape index: {}]   ;;  %s1375_s6 = inlined_call_operand.vmem [shape: f32[1,128], index: 6, kind: input, shape index: {}]   ;;  %s1376_s7 = inlined_call_operand.hbm [shape: f32[16,128], index: 7, kind: output, shape index: {}]  }
   0x1   :  { %1377 = sst [smem:[#allocation17_spill]] %s1370_s1 }
   0x2   :  { %1378 = sst [smem:[#allocation18_spill]] %s1371_s2 }
   0x3   :  { %12 = vsyncpa [#allocation4], 0 }
   0x4   :  { %14 = vsyncpa [#allocation4 + $0x1], 0 }
   0x5   :  { %15 = vsyncpa [#allocation7], 0 }
   0x6   :  { %16 = vsyncpa [#allocation10], 0 }
   0x7   :  { %17 = vsyncpa [#allocation5], 0 }
   0x8   :  { %19 = vsyncpa [#allocation5 + $0x1], 0  ;;  %s1188_s24 = smov 0   ;;  %s1190_s25 = smov 0  }
   0x9   :  { %s1192_s26 = smov 0   ;;  %s1194_s27 = smov 0  }
   0xa LB: > { %s1379_s1 = sld [smem:[#allocation17_spill]]  ;;  %s1212_s8 = sadd.s32 4294967295, %s1138_s27   ;;  %s1138_s27 = sphi %s1194_s27, %s1392_s27   ;;  %s1134_s26 = sphi %s1192_s26, %s1391_s26   ;;  %s1130_s25 = sphi %s1190_s25, %s1390_s25   ;;  %s1126_s24 = sphi %s1188_s24, %s1389_s24  }
   0xb   : > { %p798_p0 = scmp.ge.s32.totalorder %s1138_s27, 1  ;;  %p46_p1 = scmp.eq.s32.totalorder %s1212_s8, 0 }
   0xc   : > { %p208_p2 = scmp.lt.s32.totalorder %s1138_s27, 3  ;;  %s1140_s10 = smov [#allocation6]  }
   0xd   : > { %s221_s11 = sshll.u32 %s1140_s10, 4  ;;  %s245_s14 = sshll.u32 %s1372_s3, 4  ;;  %s222_s11 = int_to_ptr.vmem [resolvable:$true] %s221_s11  ;;  %s246_s14 = int_to_ptr.hbm [resolvable:$true] %s245_s14 }
   0xe   : > { %p1217_p3 = pnand %p798_p0, %p208_p2  ;;  %s1141_s16 = smov [#allocation9]  }
   0xf   : > { %s247_s17 = sshll.u32 %s1141_s16, 4  ;;  %s1142_s18 = smov 512   ;;  %s248_s17 = int_to_ptr.vmem [resolvable:$true] %s247_s17 }
  0x10   : > { %s219_s30 = sshll.u32 %s1379_s1, 4  ;;  %p841_p4 = pneg %p1217_p3  ;;  %s220_s30 = int_to_ptr.hbm [resolvable:$true] %s219_s30 }
  0x11   : > { %s1143_s19 = smov 32   ;;  %s1144_s20 = smov 128  }
  0x12   : > { %p1229_p6 = pnand %p841_p4, %p46_p1  ;;  %s1145_s21 = smov 8  }
  0x13   : > { %s1382_s2 = sld [smem:[#allocation18_spill]]  ;;  %s1146_s29 = smov [#allocation8]  }
  0x14   : > { %844 = dma.hbm_to_vmem [thread:$0]  (!%p1229_p6), %s220_s30, 2048, %s222_s11, [#allocation7], %s1142_s18, %s1142_s18, %s1143_s19  }
  0x15   : > { %850 = dma.hbm_to_vmem [thread:$0]  (!%p1229_p6), %s246_s14, 8192, %s248_s17, [#allocation10], %s1144_s20, %s1144_s20, %s1145_s21  }
  0x16   : > { %s236_s30 = sshll.u32 %s1146_s29, 4  ;;  %s262_s12 = sshll.u32 %s1374_s5, 4  ;;  %s237_s30 = int_to_ptr.vmem [resolvable:$true] %s236_s30  ;;  %s263_s12 = int_to_ptr.hbm [resolvable:$true] %s262_s12 }
  0x17   : > { %s1147_s13 = smov [#allocation11]   ;;  %s797_s16 = sadd.s32 4294967294, %s1138_s27  }
  0x18   : > { %s264_s14 = sshll.u32 %s1147_s13, 4  ;;  %s1249_s17 = sadd.s32 1, %s1138_s27   ;;  %s265_s14 = int_to_ptr.vmem [resolvable:$true] %s264_s14 }
  0x19   : > { %s234_s28 = sshll.u32 %s1382_s2, 4  ;;  %s29_s18 = ssub.s32 %s1138_s27, %s1249_s17  ;;  %s235_s28 = int_to_ptr.hbm [resolvable:$true] %s234_s28 }
  0x1a   : > { %847 = dma.hbm_to_vmem [thread:$0]  (!%p1229_p6), %s235_s28, 64, %s237_s30, [#allocation7]  }
  0x1b   : > { %853 = dma.hbm_to_vmem [thread:$0]  (!%p1229_p6), %s263_s12, 2048, %s265_s14, [#allocation10], %s1144_s20, %s1144_s20, %s1145_s21  }
  0x1c   : > { %s32_s19 = sadd.s32 1, %s1134_s26  ;;  %p30_p7 = scmp.eq.s32.totalorder %s29_s18, 0 }
  0x1d   : > { %p39_p8 = scmp.ne.s32.totalorder %s1134_s26, %s1130_s25  ;;  %p40_p9 = scmp.eq.s32.totalorder %s1138_s27, 0 }
  0x1e   : > { %p45_p10 = scmp.ne.s32.totalorder %s1130_s25, %s1126_s24  ;;  %p195_p13 = scmp.eq.s32.totalorder %s1212_s8, 1 }
  0x1f   : > { %s1260_s22 = scalar_select %p30_p7, %s1134_s26, %s32_s19  }
  0x20   : > { %p1262_p11 = por %p40_p9, %p39_p8  ;;  %p1268_p12 = por %p46_p1, %p45_p10 }
  0x21   : > { %p201_p0 = scmp.eq.s32.totalorder %s797_s16, 1  ;;  %p866_p2 = scmp.lt.s32.totalorder %s1138_s27, 2 }
  0x22   : > { %s281_s20 = sand.u32 1, %s1134_s26   ;;  %p1275_p4 = por %p195_p13, %p39_p8 }
  0x23   : > { %p1279_p6 = por %p201_p0, %p45_p10  ;;  %s804_s29 = sshll.u32 %s281_s20, 3 }
  0x24   : > { %s805_s30 = sshll.u32 %s1138_s27, 3  ;;  %s285_s13 = scalar_lea.vmem [#allocation3], %s804_s29 }
  0x25   : > { %s289_s12 = scalar_lea.hbm %s1369_s0, %s805_s30  ;;  %s293_s14 = sshll.u32 %s285_s13, 4  ;;  %s294_s14 = int_to_ptr.vmem [resolvable:$true] %s293_s14 }
  0x26   : > { %s291_s18 = sshll.u32 %s289_s12, 4  ;;  %p1289_p7 = pnand %p866_p2, %p1262_p11  ;;  %s292_s18 = int_to_ptr.hbm [resolvable:$true] %s291_s18 }
  0x27   : > { %s282_s19 = scalar_lea.sflag [#allocation4], %s281_s20  ;;  %s1034_s1 = sshra.s32 %s292_s18, 4  ;;  %s1035_s1 = int_to_ptr.hbm [resolvable:$true] %s1034_s1 }
  0x28   : > { %s1036_s2 = scalar_lea.hbm %s1035_s1, 8  ;;  %p1038_p9 = pneg %p1289_p7 }
  0x29   : > { %p1037_p8 = scmp.ne.s32.totalorder %s1035_s1, %s1036_s2  ;;  %s1041_s10 = scalar_lea.hbm %s1369_s0, 16 }
  0x2a   : > { %p1042_p11 = scmp.lt.s32.totalorder %s1035_s1, %s1369_s0  ;;  %p1043_p0 = scmp.lt.s32.totalorder %s1041_s10, %s1036_s2 }
  0x2b   : > { %p1039_p10 = pnand %p1038_p9, %p1037_p8 }
  0x2c   : > { %p1044_p2 = por %p1043_p0, %p1042_p11 }
  0x2d   : > { %p1040_p13 = pneg %p1039_p10 }
  0x2f   : > { %p1045_p5 = pnand %p1044_p2, %p1040_p13 }
  0x31   : > { %1048 = shalt.err (!%p1045_p5)
}
  0x32   : > { %857 = dma.hbm_to_vmem [thread:$0]  (!%p1289_p7), %s292_s18, 128, %s294_s14, %s282_s19  }
  0x33   : > { %302 = sbr.rel (%p1217_p3) target bundleno = 474 (0x1da), region = 48  ;;  %s1306_s20 = sand.u32 (!%p1217_p3), 1, %s1130_s25  }
  0x34   : > { %s807_s12 = sshll.u32 (!%p1217_p3), %s1306_s20, 3  ;;  %s305_s13 = scalar_lea.sflag (!%p1217_p3), [#allocation4], %s1306_s20 }
  0x35   : > { %s308_s1 = scalar_lea.vmem (!%p1217_p3), [#allocation3], %s807_s12 }
  0x38   : > { %1109 = dma.done.wait (%p1268_p12), %s305_s13, 128  }
  0x39   : > { %1111 = vsyncadd (%p1268_p12), %s305_s13, 4294967168 }
  0x3a   : > { %1113 = dma.done.wait (%p46_p1), [#allocation7], 2112  }
  0x3b   : > { %1115 = vsyncadd (%p46_p1), [#allocation7], 4294965184 }
  0x3c   : > { %1117 = dma.done.wait (%p46_p1), [#allocation10], 10240  }
  0x3d   : > { %1119 = vsyncadd (%p46_p1), [#allocation10], 4294957056  ;;  %v373_v0 = vld [vmem:[#allocation6 + $0x60] sm:$0xff]  ;;  %v375_v1 = vld [vmem:[#allocation6 + $0x70] sm:$0xff]  ;;  %vm387_vm0 = vcmask 261120   ;;  %s818_s15 = sshll.u32 %s1212_s8, 3 }
  0x3e   : > { %v369_v2 = vld [vmem:[#allocation6 + $0x40] sm:$0xff]  ;;  %403 = vmatpush.msra.mxu1 %v373_v0  ;;  %443 = vmatpush.msra.mxu2 %v375_v1  ;;  %v371_v3 = vld [vmem:[#allocation6 + $0x50] sm:$0xff]  ;;  %v376_v4 = vld [vmem:[#allocation6 + $0x78] sm:$0xff]  ;;  %s684_s16 = scalar_lea.hbm %s1376_s7, %s818_s15  ;;  %s359_s30 = scalar_lea.vmem [#allocation12], %s807_s12 }
  0x3f   : > { %463 = vmatpush.msra.mxu3 %v376_v4  ;;  %v365_v5 = vld [vmem:[#allocation6 + $0x20] sm:$0xff]  ;;  %v367_v6 = vld [vmem:[#allocation6 + $0x30] sm:$0xff]  ;;  %v372_v7 = vld [vmem:[#allocation6 + $0x58] sm:$0xff]  ;;  %s686_s10 = sshll.u32 %s359_s30, 4  ;;  %s688_s11 = sshll.u32 %s684_s16, 4  ;;  %s687_s10 = int_to_ptr.vmem [resolvable:$true] %s686_s10  ;;  %s689_s11 = int_to_ptr.hbm [resolvable:$true] %s688_s11 }
  0x40   : > { %404 = vmatpush.msra.mxu1 %v369_v2  ;;  %444 = vmatpush.msra.mxu2 %v371_v3  ;;  %v368_v8 = vld [vmem:[#allocation6 + $0x38] sm:$0xff]  ;;  %v361_v9 = vld [vmem:[#allocation6] sm:$0xff]  ;;  %v363_v10 = vld [vmem:[#allocation6 + $0x10] sm:$0xff]  ;;  %s674_s23 = scalar_lea.sflag [#allocation5], %s1306_s20  ;;  %s1078_s8 = sshra.s32 %s689_s11, 4  ;;  %s1079_s8 = int_to_ptr.hbm [resolvable:$true] %s1078_s8 }
  0x41   : > { %464 = vmatpush.msra.mxu3 %v372_v7  ;;  %v360_v11 = vld [vmem:[%s308_s1] sm:$0xff]  ;;  %v374_v13 = vld [vmem:[#allocation6 + $0x68] sm:$0xff]  ;;  %s1080_s13 = scalar_lea.hbm %s1079_s8, 8  ;;  %s1084_s9 = scalar_lea.hbm %s1376_s7, 16 }
  0x42   : > { %405 = vmatpush.msra.mxu1 %v365_v5  ;;  %445 = vmatpush.msra.mxu2 %v367_v6  ;;  %v498_v12 = vld [vmem:[#allocation9 + $0x78] sm:$0xff]  ;;  %v497_v15 = vld [vmem:[#allocation9 + $0x70] sm:$0xff]  ;;  %v370_v16 = vld [vmem:[#allocation6 + $0x48] sm:$0xff]  ;;  %p1081_p1 = scmp.ne.s32.totalorder %s1079_s8, %s1080_s13  ;;  %p1085_p12 = scmp.lt.s32.totalorder %s1079_s8, %s1376_s7 }
  0x43   : > { %465 = vmatpush.msra.mxu3 %v368_v8  ;;  %v364_v14 = vld [vmem:[#allocation6 + $0x18] sm:$0xff]  ;;  %551 = vmatpush.msra.mxu0 %v498_v12  ;;  %v496_v18 = vld [vmem:[#allocation9 + $0x68] sm:$0xff]  ;;  %v495_v22 = vld [vmem:[#allocation9 + $0x60] sm:$0xff]  ;;  %p1086_p7 = scmp.lt.s32.totalorder %s1084_s9, %s1080_s13 }
  0x44   : > { %406 = vmatpush.msra.mxu1 %v361_v9  ;;  %446 = vmatpush.msra.mxu2 %v363_v10  ;;  %v530_v17 = vld [vmem:[#allocation9 + $0x178] sm:$0xff]  ;;  %v366_v20 = vld [vmem:[#allocation6 + $0x28] sm:$0xff]  ;;  %v529_v21 = vld [vmem:[#allocation9 + $0x170] sm:$0xff]  ;;  %p1082_p3 = pnand %p1081_p1, %p1275_p4 }
  0x45   : > { %813 = vmatmul.msk.f32.vlgmr.msra.gmra.mxu1 %vm387_vm0, %v360_v11  ;;  %815 = vmatmul.msk.f32.vlgmr.msra.gmra.mxu2 %vm387_vm0, %v360_v11  ;;  %v546_v19 = vld [vmem:[#allocation9 + $0x1f8] sm:$0xff]  ;;  %v545_v23 = vld [vmem:[#allocation9 + $0x1f0] sm:$0xff]  ;;  %v362_v24 = vld [vmem:[#allocation6 + $0x8] sm:$0xff]  ;;  %p1087_p8 = por %p1086_p7, %p1085_p12 }
  0x46   : > { %423 = vmatpush.msrb.mxu1 %v374_v13  ;;  %466 = vmatpush.msra.mxu3 %v364_v14  ;;  %v528_v25 = vld [vmem:[#allocation9 + $0x168] sm:$0xff]  ;;  %v494_v26 = vld [vmem:[#allocation9 + $0x58] sm:$0xff]  ;;  %v527_v28 = vld [vmem:[#allocation9 + $0x160] sm:$0xff]  ;;  %p1083_p5 = pneg %p1082_p3 }
  0x47   : > { %816 = vmatmul.msk.f32.vlgmr.msra.gmra.mxu3 %vm387_vm0, %v360_v11  ;;  %552 = vmatpush.msra.mxu0 %v497_v15  ;;  %v514_v27 = vld [vmem:[#allocation9 + $0xf8] sm:$0xff]  ;;  %v493_v29 = vld [vmem:[#allocation9 + $0x50] sm:$0xff]  ;;  %v544_v30 = vld [vmem:[#allocation9 + $0x1e8] sm:$0xff] }
  0x48   : > { %424 = vmatpush.msrb.mxu1 %v370_v16  ;;  %591 = vmatpush.msrb.mxu2 %v530_v17  ;;  %v513_v31 = vld [vmem:[#allocation9 + $0xf0] sm:$0xff]  ;;  %v526_v32 = vld [vmem:[#allocation9 + $0x158] sm:$0xff]  ;;  %v492_v33 = vld [vmem:[#allocation9 + $0x48] sm:$0xff]  ;;  %p1088_p9 = pnand %p1087_p8, %p1083_p5 }
  0x49   : > { %553 = vmatpush.msra.mxu0 %v496_v18  ;;  %611 = vmatpush.msrb.mxu3 %v546_v19  ;;  %v543_v34 = vld [vmem:[#allocation9 + $0x1e0] sm:$0xff]  ;;  %v512_v35 = vld [vmem:[#allocation9 + $0xe8] sm:$0xff]  ;;  %v525_v37 = vld [vmem:[#allocation9 + $0x150] sm:$0xff] }
  0x4a   : > { %425 = vmatpush.msrb.mxu1 %v366_v20  ;;  %592 = vmatpush.msrb.mxu2 %v529_v21  ;;  %v491_v36 = vld [vmem:[#allocation9 + $0x40] sm:$0xff]  ;;  %v542_v38 = vld [vmem:[#allocation9 + $0x1d8] sm:$0xff]  ;;  %v524_v40 = vld [vmem:[#allocation9 + $0x148] sm:$0xff] }
  0x4b   : > { %554 = vmatpush.msra.mxu0 %v495_v22  ;;  %612 = vmatpush.msrb.mxu3 %v545_v23  ;;  %v511_v39 = vld [vmem:[#allocation9 + $0xe0] sm:$0xff]  ;;  %v490_v41 = vld [vmem:[#allocation9 + $0x38] sm:$0xff]  ;;  %v541_v42 = vld [vmem:[#allocation9 + $0x1d0] sm:$0xff] }
  0x4c   : > { %426 = vmatpush.msrb.mxu1 %v362_v24  ;;  %593 = vmatpush.msrb.mxu2 %v528_v25  ;;  %v510_v43 = vld [vmem:[#allocation9 + $0xd8] sm:$0xff]  ;;  %v523_v44 = vld [vmem:[#allocation9 + $0x140] sm:$0xff]  ;;  %v489_v45 = vld [vmem:[#allocation9 + $0x30] sm:$0xff] }
  0x4d   : > { %814 = vmatmul.msk.f32.vlgmr.msrb.gmra.mxu1 %vm387_vm0, %v360_v11  ;;  %555 = vmatpush.msra.mxu0 %v494_v26  ;;  %v540_v46 = vld [vmem:[#allocation9 + $0x1c8] sm:$0xff]  ;;  %v509_v47 = vld [vmem:[#allocation9 + $0xd0] sm:$0xff]  ;;  %v522_v48 = vld [vmem:[#allocation9 + $0x138] sm:$0xff] }
  0x4e   : > { %571 = vmatpush.msra.mxu1 %v514_v27  ;;  %594 = vmatpush.msrb.mxu2 %v527_v28  ;;  %v488_v49 = vld [vmem:[#allocation9 + $0x28] sm:$0xff]  ;;  %v539_v50 = vld [vmem:[#allocation9 + $0x1c0] sm:$0xff]  ;;  %v521_v52 = vld [vmem:[#allocation9 + $0x130] sm:$0xff] }
  0x4f   : > { %556 = vmatpush.msra.mxu0 %v493_v29  ;;  %613 = vmatpush.msrb.mxu3 %v544_v30  ;;  %v508_v51 = vld [vmem:[#allocation9 + $0xc8] sm:$0xff]  ;;  %v487_v53 = vld [vmem:[#allocation9 + $0x20] sm:$0xff]  ;;  %v538_v54 = vld [vmem:[#allocation9 + $0x1b8] sm:$0xff] }
  0x50   : > { %572 = vmatpush.msra.mxu1 %v513_v31  ;;  %595 = vmatpush.msrb.mxu2 %v526_v32  ;;  %v507_v55 = vld [vmem:[#allocation9 + $0xc0] sm:$0xff]  ;;  %v506_v56 = vld [vmem:[#allocation9 + $0xb8] sm:$0xff]  ;;  %v505_v58 = vld [vmem:[#allocation9 + $0xb0] sm:$0xff] }
  0x51   : > { %557 = vmatpush.msra.mxu0 %v492_v33  ;;  %614 = vmatpush.msrb.mxu3 %v543_v34  ;;  %v486_v57 = vld [vmem:[#allocation9 + $0x18] sm:$0xff]  ;;  %v520_v59 = vld [vmem:[#allocation9 + $0x128] sm:$0xff]  ;;  %v537_v60 = vld [vmem:[#allocation9 + $0x1b0] sm:$0xff] }
  0x52   : > { %573 = vmatpush.msra.mxu1 %v512_v35  ;;  %596 = vmatpush.msrb.mxu2 %v525_v37  ;;  %v485_v61 = vld [vmem:[#allocation9 + $0x10] sm:$0xff]  ;;  %v504_v62 = vld [vmem:[#allocation9 + $0xa8] sm:$0xff]  ;;  %v519_v63 = vld [vmem:[#allocation9 + $0x120] sm:$0xff] }
  0x53   : > { %558 = vmatpush.msra.mxu0 %v491_v36  ;;  %615 = vmatpush.msrb.mxu3 %v542_v38  ;;  %v536_v0 = vld [vmem:[#allocation9 + $0x1a8] sm:$0xff]  ;;  %v503_v2 = vld [vmem:[#allocation9 + $0xa0] sm:$0xff]  ;;  %v518_v3 = vld [vmem:[#allocation9 + $0x118] sm:$0xff] }
  0x54   : > { %574 = vmatpush.msra.mxu1 %v511_v39  ;;  %597 = vmatpush.msrb.mxu2 %v524_v40  ;;  %v484_v1 = vld [vmem:[#allocation9 + $0x8] sm:$0xff]  ;;  %v535_v4 = vld [vmem:[#allocation9 + $0x1a0] sm:$0xff]  ;;  %v502_v6 = vld [vmem:[#allocation9 + $0x98] sm:$0xff] }
  0x55   : > { %559 = vmatpush.msra.mxu0 %v490_v41  ;;  %616 = vmatpush.msrb.mxu3 %v541_v42  ;;  %v483_v5 = vld [vmem:[#allocation9] sm:$0xff]  ;;  %v517_v7 = vld [vmem:[#allocation9 + $0x110] sm:$0xff]  ;;  %v534_v8 = vld [vmem:[#allocation9 + $0x198] sm:$0xff] }
  0x56   : > { %575 = vmatpush.msra.mxu1 %v510_v43  ;;  %598 = vmatpush.msrb.mxu2 %v523_v44  ;;  %v501_v9 = vld [vmem:[#allocation9 + $0x90] sm:$0xff]  ;;  %v516_v10 = vld [vmem:[#allocation9 + $0x108] sm:$0xff]  ;;  %v515_v13 = vld [vmem:[#allocation9 + $0x100] sm:$0xff] }
  0x57   : > { %560 = vmatpush.msra.mxu0 %v489_v45  ;;  %617 = vmatpush.msrb.mxu3 %v540_v46  ;;  %v533_v11 = vld [vmem:[#allocation9 + $0x190] sm:$0xff]  ;;  %v500_v12 = vld [vmem:[#allocation9 + $0x88] sm:$0xff]  ;;  %v499_v15 = vld [vmem:[#allocation9 + $0x80] sm:$0xff] }
  0x58   : > { %576 = vmatpush.msra.mxu1 %v509_v47  ;;  %599 = vmatpush.msrb.mxu2 %v522_v48  ;;  %v532_v14 = vld [vmem:[#allocation9 + $0x188] sm:$0xff]  ;;  %v531_v16 = vld [vmem:[#allocation9 + $0x180] sm:$0xff]  ;;  %v647_v17 = vld [vmem:[#allocation11 + $0x78] sm:$0xff] }
  0x59   : > { %561 = vmatpush.msra.mxu0 %v488_v49  ;;  %618 = vmatpush.msrb.mxu3 %v539_v50  ;;  %v646_v18 = vld [vmem:[#allocation11 + $0x70] sm:$0xff]  ;;  %v645_v19 = vld [vmem:[#allocation11 + $0x68] sm:$0xff]  ;;  %v644_v20 = vld [vmem:[#allocation11 + $0x60] sm:$0xff] }
  0x5a   : > { %577 = vmatpush.msra.mxu1 %v508_v51  ;;  %600 = vmatpush.msrb.mxu2 %v521_v52  ;;  %v643_v21 = vld [vmem:[#allocation11 + $0x58] sm:$0xff]  ;;  %v642_v22 = vld [vmem:[#allocation11 + $0x50] sm:$0xff]  ;;  %v641_v23 = vld [vmem:[#allocation11 + $0x48] sm:$0xff] }
  0x5b   : > { %562 = vmatpush.msra.mxu0 %v487_v53  ;;  %619 = vmatpush.msrb.mxu3 %v538_v54  ;;  %v377_v24 = vld [vmem:[#allocation8] sm:$0xf]  ;;  %v640_v41 = vld [vmem:[#allocation11 + $0x40] sm:$0xff]  ;;  %v638_v43 = vld [vmem:[#allocation11 + $0x30] sm:$0xff] }
  0x5c   : > { %578 = vmatpush.msra.mxu1 %v507_v55  ;;  %601 = vmatpush.msrb.mxu2 %v520_v59  ;;  %v379_v25 = vperm.slane %v377_v24, 0  ;;  %v381_v29 = vperm.slane %v377_v24, 2  ;;  %v380_v30 = vperm.slane %v377_v24, 1  ;;  %v382_v31 = vperm.slane %v377_v24, 3  ;;  %v639_v42 = vld [vmem:[#allocation11 + $0x38] sm:$0xff]  ;;  %v637_v44 = vld [vmem:[#allocation11 + $0x28] sm:$0xff] }
  0x5d   : > { %563 = vmatpush.msra.mxu0 %v486_v57  ;;  %620 = vmatpush.msrb.mxu3 %v537_v60  ;;  %v636_v45 = vld [vmem:[#allocation11 + $0x20] sm:$0xff]  ;;  %v635_v46 = vld [vmem:[#allocation11 + $0x18] sm:$0xff]  ;;  %v634_v47 = vld [vmem:[#allocation11 + $0x10] sm:$0xff] }
  0x5e   : > { %579 = vmatpush.msra.mxu1 %v506_v56  ;;  %602 = vmatpush.msrb.mxu2 %v519_v63  ;;  %v633_v48 = vld [vmem:[#allocation11 + $0x8] sm:$0xff]  ;;  %v632_v49 = vld [vmem:[#allocation11] sm:$0xff] }
  0x5f   : > { %564 = vmatpush.msra.mxu0 %v485_v61  ;;  %621 = vmatpush.msrb.mxu3 %v536_v0  ;;  %v912_v50 = vld [vmem:[%s1373_s4] ss:$0 sm:$0xff] }
  0x60   : > { %580 = vmatpush.msra.mxu1 %v505_v58  ;;  %603 = vmatpush.msrb.mxu2 %v518_v3  ;;  %v913_v60 = vld [vmem:[%s1375_s6] ss:$0 sm:$0xff] }
  0x61   : > { %565 = vmatpush.msra.mxu0 %v484_v1  ;;  %622 = vmatpush.msrb.mxu3 %v535_v4 }
  0x62   : > { %581 = vmatpush.msra.mxu1 %v504_v62  ;;  %604 = vmatpush.msrb.mxu2 %v517_v7 }
  0x63   : > { %566 = vmatpush.msra.mxu0 %v483_v5  ;;  %623 = vmatpush.msrb.mxu3 %v534_v8 }
  0x64   : > { %582 = vmatpush.msra.mxu1 %v503_v2  ;;  %605 = vmatpush.msrb.mxu2 %v516_v10 }
  0x65   : > { %624 = vmatpush.msrb.mxu3 %v533_v11  ;;  %652 = vmatpush.msrb.mxu0 %v647_v17 }
  0x66   : > { %583 = vmatpush.msra.mxu1 %v502_v6  ;;  %606 = vmatpush.msrb.mxu2 %v515_v13 }
  0x67   : > { %625 = vmatpush.msrb.mxu3 %v532_v14  ;;  %653 = vmatpush.msrb.mxu0 %v646_v18 }
  0x68   : > { %584 = vmatpush.msra.mxu1 %v501_v9 }
  0x69   : > { %626 = vmatpush.msrb.mxu3 %v531_v16  ;;  %654 = vmatpush.msrb.mxu0 %v645_v19 }
  0x6a   : > { %585 = vmatpush.msra.mxu1 %v500_v12 }
  0x6b   : > { %655 = vmatpush.msrb.mxu0 %v644_v20 }
  0x6c   : > { %586 = vmatpush.msra.mxu1 %v499_v15 }
  0x6d   : > { %656 = vmatpush.msrb.mxu0 %v643_v21 }
  0x6f   : > { %657 = vmatpush.msrb.mxu0 %v642_v22 }
  0x71   : > { %658 = vmatpush.msrb.mxu0 %v641_v23 }
  0x73   : > { %659 = vmatpush.msrb.mxu0 %v640_v41 }
  0x75   : > { %660 = vmatpush.msrb.mxu0 %v639_v42 }
  0x77   : > { %661 = vmatpush.msrb.mxu0 %v638_v43 }
  0x79   : > { %662 = vmatpush.msrb.mxu0 %v637_v44 }
  0x7b   : > { %663 = vmatpush.msrb.mxu0 %v636_v45 }
  0x7d   : > { %664 = vmatpush.msrb.mxu0 %v635_v46 }
  0x7f   : > { %665 = vmatpush.msrb.mxu0 %v634_v47 }
  0x81   : > { %666 = vmatpush.msrb.mxu0 %v633_v48 }
  0x83   : > { %667 = vmatpush.msrb.mxu0 %v632_v49 }
  0xc2   : > { %v408_v26 = vpop.f32.mrf.mxu1 }
  0xc3   : > { %v409_v27 = vadd.f32 %v408_v26, %v379_v25 }
  0xc5   : > { %v471_v28 = vmax.f32 %v409_v27, 0.0 }
  0xc7   : > { %567 = vmatmul.f32.vlgmr.msra.gmra.mxu0 %v471_v28 }
  0xc8   : > { %v448_v32 = vpop.f32.mrf.mxu2 }
  0xc9   : > { %v449_v33 = vadd.f32 %v448_v32, %v381_v29 }
  0xca   : > { %v428_v34 = vpop.f32.mrf.mxu1  ;;  %v468_v35 = vpop.f32.mrf.mxu3 }
  0xcb   : > { %v473_v36 = vmax.f32 %v449_v33, 0.0  ;;  %v429_v37 = vadd.f32 %v428_v34, %v380_v30  ;;  %v469_v38 = vadd.f32 %v468_v35, %v382_v31 }
  0xcd   : > { %v472_v39 = vmax.f32 %v429_v37, 0.0  ;;  %v474_v40 = vmax.f32 %v469_v38, 0.0  ;;  %607 = vmatmul.f32.vlgmr.msrb.gmra.mxu2 %v473_v36 }
  0xcf   : > { %587 = vmatmul.f32.vlgmr.msra.gmra.mxu1 %v472_v39  ;;  %627 = vmatmul.f32.vlgmr.msrb.gmra.mxu3 %v474_v40 }
 0x144   : > { %v568_v51 = vpop.f32.mrf.mxu0 }
 0x145   : > { %v569_v53 = vadd.f32 %v912_v50, %v568_v51 }
 0x14c   : > { %v588_v52 = vpop.f32.mrf.mxu1 }
 0x14d   : > { %v589_v54 = vadd.f32 %v588_v52, %v569_v53 }
 0x150   : > { %v608_v55 = vpop.f32.mrf.mxu2 }
 0x151   : > { %v609_v56 = vadd.f32 %v608_v55, %v589_v54 }
 0x152   : > { %v628_v57 = vpop.f32.mrf.mxu3 }
 0x153   : > { %v629_v58 = vadd.f32 %v628_v57, %v609_v56 }
 0x155   : > { %v631_v59 = vmax.f32 %v629_v58, 0.0 }
 0x157   : > { %668 = vmatmul.f32.vlgmr.msrb.gmra.mxu0 %v631_v59 }
 0x1d4   : > { %v669_v61 = vpop.f32.mrf.mxu0 }
 0x1d5   : > { %v670_v62 = vadd.f32 %v913_v60, %v669_v61 }
 0x1d7   : > { %672 = vst [vmem:[%s359_s30] sm:$0xff] %v670_v62 }
 0x1d8   : > { %1091 = shalt.err (!%p1088_p9)
}
 0x1d9   : > { %839 = dma.vmem_to_hbm [thread:$0]  (%p1275_p4), %s687_s10, 128, %s689_s11, %s674_s23  }
 0x1da PF: > { %s700_s20 = sand.u32 1, %s1126_s24   ;;  %p1388_p10 = scmp.ge.s32.totalorder %s1138_s27, 2 }
 0x1db   : > { %s701_s14 = scalar_lea.sflag [#allocation5], %s700_s20 }
 0x1dc   : > { %p859_p13 = pnand %p1388_p10, %p1279_p6 }
 0x1de   : > { %p860_p11 = pneg %p859_p13 }
 0x1e0   : > { %1121 = dma.done.wait (%p860_p11), %s701_s14, 128  }
 0x1e1   : > { %1123 = vsyncadd (%p860_p11), %s701_s14, 4294967168  ;;  %p22_p0 = scmp.ge.s32.totalorder %s1249_s17, 4   ;;  %s1389_s24 = smov %s1130_s25 }
 0x1e2   : > { %s1390_s25 = smov %s1134_s26  ;;  %s1391_s26 = smov %s1260_s22 }
 0x1e3   : > { %s1392_s27 = smov %s1249_s17  ;;  %24 = sbr.rel (!%p22_p0) target bundleno = 10 (0xa), region = 109 }
 0x1e8   :  { %707 = vsyncpa [#allocation4], 1 }
 0x1e9   :  { %709 = vsyncpa [#allocation4 + $0x1], 1 }
 0x1ea   :  { %710 = vsyncpa [#allocation7], 1 }
 0x1eb   :  { %711 = vsyncpa [#allocation10], 1 }
 0x1ec   :  { %712 = vsyncpa [#allocation5], 1 }
 0x1ed   :  { %714 = vsyncpa [#allocation5 + $0x1], 1 }

</bundles_post_ra>
